<compile_context>
chip_gen: v6e
topology: v6e:2x2x1
jax: 0.10.0
libtpu: 0.0.40
codegen_flags: <defaults>
</compile_context>

<pallas_src>
import jax
import jax.numpy as jnp
from jax.experimental import pallas as pl
from jax.experimental.pallas import tpu as pltpu

EPS = 1e-11
SMOOTH = 1.0

# Per-input, per-block VMEM budget.  2 inputs x 2 (or 3) buffers x 4 MiB plus
# two f32 accumulators stays well under v7x's 64 MiB/TC (tightest generation),
# while blocks this size already sit at the ~85% HBM-roofline plateau.
_BLOCK_BUDGET_BYTES = 4 * 1024 * 1024


def _logcosh_dice_partials_kernel(p_ref, t_ref, int_ref, pt_ref, acc_int, acc_pt):
    i = pl.program_id(1)           # batch-block axis (arbitrary)
    r = pl.program_id(2)           # row-block axis   (arbitrary)

    @pl.when(jnp.logical_and(i == 0, r == 0))
    def _init():
        acc_int[...] = jnp.zeros_like(acc_int)
        acc_pt[...] = jnp.zeros_like(acc_pt)

    p = p_ref[...].astype(jnp.float32)        # (tile_n, tile_r, lanes)
    t = t_ref[...].astype(jnp.float32)

    # Pure elementwise / leading-axis adds (VPU); no cross-lane work in the loop.
    acc_int[...] += jnp.sum(p * t, axis=0)
    acc_pt[...] += jnp.sum(p + t, axis=0)

    @pl.when(jnp.logical_and(i == pl.num_programs(1) - 1,
                             r == pl.num_programs(2) - 1))
    def _finalize():
        # Cross-lane reductions happen exactly once per core.
        int_ref[...] = jnp.sum(acc_int[...], keepdims=True)   # (1, 1)
        pt_ref[...] = jnp.sum(acc_pt[...], keepdims=True)     # (1, 1)


def _largest_divisor(n, cap, multiple_of=1):
    """Largest divisor of n that is <= cap and a multiple of `multiple_of`;
    falls back to n itself if no such divisor exists."""
    best = None
    for d in range(1, n + 1):
        if n % d == 0 and d <= cap and d % multiple_of == 0:
            best = d
    return best if best is not None else n


@jax.jit
def logcosh_dice_loss(y_pred, y_true):
    assert y_pred.shape == y_true.shape
    n, c, h, w = y_pred.shape
    itemsize = jnp.dtype(y_pred.dtype).itemsize

    # Lane-dense spatial layout when possible (free reshape of contiguous NCHW).
    if (h * w) % 128 == 0:
        rows, lanes = (h * w) // 128, 128
        xp = y_pred.reshape(n, c, rows, lanes)
        xt = y_true.reshape(n, c, rows, lanes)
    else:
        rows, lanes = h, w
        xp, xt = y_pred, y_true

    # Leading "parallel" axis: shards the batch across v7x's two TensorCores.
    split = 2 if (n >= 2 and n % 2 == 0) else 1
    n_inner = n // split

    slab_bytes = rows * lanes * itemsize          # one batch element, channel 0
    if slab_bytes <= _BLOCK_BUDGET_BYTES:
        tile_r = rows
        tile_n = _largest_divisor(n_inner, max(1, _BLOCK_BUDGET_BYTES // slab_bytes))
    else:
        # A single batch element overflows the budget: tile the row axis too.
        # tile_r must be a multiple of 8 (sublane rule) or the full extent.
        tile_n = 1
        cap_r = max(1, _BLOCK_BUDGET_BYTES // (lanes * itemsize))
        tile_r = _largest_divisor(rows, cap_r, multiple_of=8)
        # TODO(synk): if rows has no multiple-of-8 divisor <= cap_r this falls
        # back to the full row extent (may overshoot the budget); a masked
        # cdiv-tail grid would remove that cliff for pathological shapes.

    n_blocks = n_inner // tile_n
    r_blocks = rows // tile_r
    grid = (split, n_blocks, r_blocks)

    block_bytes = tile_n * tile_r * lanes * itemsize
    steps_per_core = n_blocks * r_blocks
    deep_pipeline = steps_per_core >= 8 and block_bytes <= (1 << 21)
    buffers = 3 if deep_pipeline else 2

    def in_index(s, i, r, _nb=n_blocks):
        return (s * _nb + i, 0, r, 0)             # channel 0 of this batch block

    block_shape = (tile_n, None, tile_r, lanes)
    if deep_pipeline:
        in_spec = pl.BlockSpec(block_shape, in_index, pipeline_mode=pl.Buffered(3))
    else:
        in_spec = pl.BlockSpec(block_shape, in_index)

    out_spec = pl.BlockSpec((None, 1, 1), lambda s, i, r: (s, 0, 0))

    # Explicit scoped-VMEM limit: covers the multi-buffered input blocks plus
    # accumulators, exceeds v5e's 16 MiB default, capped at v7x's 64 MiB/TC.
    vmem_needed = 2 * buffers * block_bytes + 2 * tile_r * lanes * 4 + (1 << 20)
    vmem_limit = int(min(max(vmem_needed + (8 << 20), 32 << 20), 64 << 20))

    n_elems = n * rows * lanes
    cost = pl.CostEstimate(
        flops=4 * n_elems,                 # p*t, acc add, p+t, acc add
        transcendentals=0,                 # exp/log moved to the wrapper
        bytes_accessed=2 * n_elems * itemsize + 2 * split * 4,
    )

    inter_parts, pt_parts = pl.pallas_call(
        _logcosh_dice_partials_kernel,
        out_shape=(jax.ShapeDtypeStruct((split, 1, 1), jnp.float32),
                   jax.ShapeDtypeStruct((split, 1, 1), jnp.float32)),
        grid_spec=pltpu.PrefetchScalarGridSpec(
            num_scalar_prefetch=0,
            grid=grid,
            in_specs=[in_spec, in_spec],
            out_specs=[out_spec, out_spec],
            scratch_shapes=[
                pltpu.VMEM((tile_r, lanes), jnp.float32),
                pltpu.VMEM((tile_r, lanes), jnp.float32),
            ],
        ),
        compiler_params=pltpu.CompilerParams(
            dimension_semantics=("parallel", "arbitrary", "arbitrary"),
            vmem_limit_bytes=vmem_limit,
        ),
        cost_estimate=cost,
    )(xp, xt)

    # Tiny scalar epilogue: combine per-core partials -> log-cosh dice loss.
    inter = jnp.sum(inter_parts)
    pt_sum = jnp.sum(pt_parts)
    dsc = (2.0 * inter + SMOOTH) / (pt_sum + SMOOTH)
    dl = 1.0 - dsc
    cosh = (jnp.exp(dl) + jnp.exp(-dl)) * 0.5
    return jnp.log(cosh + EPS)


def _reference(y_pred, y_true):
    p = y_pred[:, 0].reshape(-1)
    t = y_true[:, 0].reshape(-1)
    inter = jnp.sum(p * t)
    dsc = (2.0 * inter + SMOOTH) / (jnp.sum(p) + jnp.sum(t) + SMOOTH)
    dl = 1.0 - dsc
    cosh = (jnp.exp(dl) + jnp.exp(-dl)) / 2.0
    return jnp.log(cosh + EPS)


if __name__ == "__main__":
    key = jax.random.PRNGKey(0)
    k1, k2 = jax.random.split(key)
    # (batch=2, channels=4, H=16, W=16), sigmoid-ish preds, binary targets
    y_pred = jax.nn.sigmoid(jax.random.normal(k1, (2, 4, 16, 16), jnp.float32))
    y_true = (jax.random.uniform(k2, (2, 4, 16, 16)) > 0.5).astype(jnp.float32)

    loss = logcosh_dice_loss(y_pred, y_true)
    loss = jax.block_until_ready(loss)

    ref = _reference(y_pred, y_true)
    assert jnp.allclose(loss, ref, rtol=1e-5, atol=1e-6), (loss, ref)
    print("KERNEL_OK")
</pallas_src>

<mosaic_0001>
module attributes {stable_mosaic.version = 11 : i64} {
  func.func @_logcosh_dice_partials_kernel(%arg0: i32, %arg1: i32, %arg2: i32, %arg3: memref<1x1x2x128xf32, #tpu.memory_space<vmem>>, %arg4: memref<1x1x2x128xf32, #tpu.memory_space<vmem>>, %arg5: memref<1x1x1xf32, #tpu.memory_space<vmem>>, %arg6: memref<1x1x1xf32, #tpu.memory_space<vmem>>, %arg7: memref<2x128xf32, #tpu.memory_space<vmem>>, %arg8: memref<2x128xf32, #tpu.memory_space<vmem>>) attributes {dimension_semantics = [#tpu.dimension_semantics<parallel>, #tpu.dimension_semantics<arbitrary>, #tpu.dimension_semantics<arbitrary>], iteration_bounds = array<i64: 2, 1, 1>, scalar_prefetch = 0 : i64, scratch_operands = 2 : i64, tpu.core_type = #tpu.core_type<tc>, window_params = [{transform_indices = @transform_0, window_bounds = array<i64: 1, 1, 2, 128>}, {transform_indices = @transform_1, window_bounds = array<i64: 1, 1, 2, 128>}, {transform_indices = @transform_2, window_bounds = array<i64: 1, 1, 1>}, {transform_indices = @transform_3, window_bounds = array<i64: 1, 1, 1>}]} {
    %c0_i32 = arith.constant 0 : i32
    %0 = arith.cmpi eq, %arg1, %c0_i32 : i32
    %c0_i32_0 = arith.constant 0 : i32
    %1 = arith.cmpi eq, %arg2, %c0_i32_0 : i32
    %2 = arith.andi %0, %1 : i1
    %3 = arith.extui %2 : i1 to i32
    %c0_i32_1 = arith.constant 0 : i32
    %4 = arith.cmpi ne, %3, %c0_i32_1 : i32
    scf.if %4 {
      %cst_21 = arith.constant 0.000000e+00 : f32
      %24 = vector.broadcast %cst_21 : f32 to vector<2x128xf32>
      %c0_22 = arith.constant 0 : index
      %c0_23 = arith.constant 0 : index
      %25 = vector.load %arg7[%c0_22, %c0_23] : memref<2x128xf32, #tpu.memory_space<vmem>>, vector<2x128xf32>
      tpu.vector_store %arg7[%c0_22, %c0_23], %24 {strides = array<i32>} : memref<2x128xf32, #tpu.memory_space<vmem>>, vector<2x128xf32>,
      %cst_24 = arith.constant 0.000000e+00 : f32
      %26 = vector.broadcast %cst_24 : f32 to vector<2x128xf32>
      %c0_25 = arith.constant 0 : index
      %c0_26 = arith.constant 0 : index
      %27 = vector.load %arg8[%c0_25, %c0_26] : memref<2x128xf32, #tpu.memory_space<vmem>>, vector<2x128xf32>
      tpu.vector_store %arg8[%c0_25, %c0_26], %26 {strides = array<i32>} : memref<2x128xf32, #tpu.memory_space<vmem>>, vector<2x128xf32>,
    } else {
    }
    %c0 = arith.constant 0 : index
    %c0_2 = arith.constant 0 : index
    %c0_3 = arith.constant 0 : index
    %c0_4 = arith.constant 0 : index
    %5 = vector.load %arg3[%c0, %c0_2, %c0_3, %c0_4] : memref<1x1x2x128xf32, #tpu.memory_space<vmem>>, vector<1x1x2x128xf32>
    %6 = vector.shape_cast %5 : vector<1x1x2x128xf32> to vector<1x2x128xf32>
    %c0_5 = arith.constant 0 : index
    %c0_6 = arith.constant 0 : index
    %c0_7 = arith.constant 0 : index
    %c0_8 = arith.constant 0 : index
    %7 = vector.load %arg4[%c0_5, %c0_6, %c0_7, %c0_8] : memref<1x1x2x128xf32, #tpu.memory_space<vmem>>, vector<1x1x2x128xf32>
    %8 = vector.shape_cast %7 : vector<1x1x2x128xf32> to vector<1x2x128xf32>
    %c0_9 = arith.constant 0 : index
    %c0_10 = arith.constant 0 : index
    %9 = vector.load %arg7[%c0_9, %c0_10] : memref<2x128xf32, #tpu.memory_space<vmem>>, vector<2x128xf32>
    %10 = arith.mulf %6, %8 : vector<1x2x128xf32>
    %cst = arith.constant dense<0.000000e+00> : vector<2x128xf32>
    %11 = vector.multi_reduction <add>, %10, %cst [0] : vector<1x2x128xf32> to vector<2x128xf32>
    %12 = arith.addf %9, %11 : vector<2x128xf32>
    %c0_11 = arith.constant 0 : index
    %c0_12 = arith.constant 0 : index
    %13 = vector.load %arg7[%c0_11, %c0_12] : memref<2x128xf32, #tpu.memory_space<vmem>>, vector<2x128xf32>
    tpu.vector_store %arg7[%c0_11, %c0_12], %12 {strides = array<i32>} : memref<2x128xf32, #tpu.memory_space<vmem>>, vector<2x128xf32>,
    %c0_13 = arith.constant 0 : index
    %c0_14 = arith.constant 0 : index
    %14 = vector.load %arg8[%c0_13, %c0_14] : memref<2x128xf32, #tpu.memory_space<vmem>>, vector<2x128xf32>
    %15 = arith.addf %6, %8 : vector<1x2x128xf32>
    %cst_15 = arith.constant dense<0.000000e+00> : vector<2x128xf32>
    %16 = vector.multi_reduction <add>, %15, %cst_15 [0] : vector<1x2x128xf32> to vector<2x128xf32>
    %17 = arith.addf %14, %16 : vector<2x128xf32>
    %c0_16 = arith.constant 0 : index
    %c0_17 = arith.constant 0 : index
    %18 = vector.load %arg8[%c0_16, %c0_17] : memref<2x128xf32, #tpu.memory_space<vmem>>, vector<2x128xf32>
    tpu.vector_store %arg8[%c0_16, %c0_17], %17 {strides = array<i32>} : memref<2x128xf32, #tpu.memory_space<vmem>>, vector<2x128xf32>,
    %c0_i32_18 = arith.constant 0 : i32
    %19 = arith.cmpi eq, %arg1, %c0_i32_18 : i32
    %c0_i32_19 = arith.constant 0 : i32
    %20 = arith.cmpi eq, %arg2, %c0_i32_19 : i32
    %21 = arith.andi %19, %20 : i1
    %22 = arith.extui %21 : i1 to i32
    %c0_i32_20 = arith.constant 0 : i32
    %23 = arith.cmpi ne, %22, %c0_i32_20 : i32
    scf.if %23 {
      %c0_21 = arith.constant 0 : index
      %c0_22 = arith.constant 0 : index
      %24 = vector.load %arg7[%c0_21, %c0_22] : memref<2x128xf32, #tpu.memory_space<vmem>>, vector<2x128xf32>
      %25 = vector.shape_cast %24 : vector<2x128xf32> to vector<1x2x128xf32>
      %cst_23 = arith.constant dense<0.000000e+00> : vector<1xf32>
      %26 = vector.multi_reduction <add>, %25, %cst_23 [1, 2] : vector<1x2x128xf32> to vector<1xf32>
      %27 = vector.shape_cast %26 : vector<1xf32> to vector<1x1x1xf32>
      %28 = vector.extract %27[0, 0, 0] : f32 from vector<1x1x1xf32>
      %29 = vector.broadcast %28 : f32 to vector<1x1xf32>
      %c0_24 = arith.constant 0 : index
      %c0_25 = arith.constant 0 : index
      %c0_26 = arith.constant 0 : index
      %30 = vector.load %arg5[%c0_24, %c0_25, %c0_26] : memref<1x1x1xf32, #tpu.memory_space<vmem>>, vector<1x1x1xf32>
      %31 = vector.shape_cast %30 : vector<1x1x1xf32> to vector<1x1xf32>
      %32 = vector.shape_cast %29 : vector<1x1xf32> to vector<1x1x1xf32>
      tpu.vector_store %arg5[%c0_24, %c0_25, %c0_26], %32 {strides = array<i32>} : memref<1x1x1xf32, #tpu.memory_space<vmem>>, vector<1x1x1xf32>,
      %c0_27 = arith.constant 0 : index
      %c0_28 = arith.constant 0 : index
      %33 = vector.load %arg8[%c0_27, %c0_28] : memref<2x128xf32, #tpu.memory_space<vmem>>, vector<2x128xf32>
      %34 = vector.shape_cast %33 : vector<2x128xf32> to vector<1x2x128xf32>
      %cst_29 = arith.constant dense<0.000000e+00> : vector<1xf32>
      %35 = vector.multi_reduction <add>, %34, %cst_29 [1, 2] : vector<1x2x128xf32> to vector<1xf32>
      %36 = vector.shape_cast %35 : vector<1xf32> to vector<1x1x1xf32>
      %37 = vector.extract %36[0, 0, 0] : f32 from vector<1x1x1xf32>
      %38 = vector.broadcast %37 : f32 to vector<1x1xf32>
      %c0_30 = arith.constant 0 : index
      %c0_31 = arith.constant 0 : index
      %c0_32 = arith.constant 0 : index
      %39 = vector.load %arg6[%c0_30, %c0_31, %c0_32] : memref<1x1x1xf32, #tpu.memory_space<vmem>>, vector<1x1x1xf32>
      %40 = vector.shape_cast %39 : vector<1x1x1xf32> to vector<1x1xf32>
      %41 = vector.shape_cast %38 : vector<1x1xf32> to vector<1x1x1xf32>
      tpu.vector_store %arg6[%c0_30, %c0_31, %c0_32], %41 {strides = array<i32>} : memref<1x1x1xf32, #tpu.memory_space<vmem>>, vector<1x1x1xf32>,
    } else {
    }
    return
  }
  func.func @transform_0(%arg0: i32, %arg1: i32, %arg2: i32) -> (i32, i32, i32, i32) {
    %c1_i32 = arith.constant 1 : i32
    %0 = arith.muli %arg0, %c1_i32 : i32
    %1 = arith.addi %0, %arg1 : i32
    %c0_i32 = arith.constant 0 : i32
    %c0_i32_0 = arith.constant 0 : i32
    %c0_i32_1 = arith.constant 0 : i32
    return %1, %c0_i32, %arg2, %c0_i32_0 : i32, i32, i32, i32
  }
  func.func @transform_1(%arg0: i32, %arg1: i32, %arg2: i32) -> (i32, i32, i32, i32) {
    %c1_i32 = arith.constant 1 : i32
    %0 = arith.muli %arg0, %c1_i32 : i32
    %1 = arith.addi %0, %arg1 : i32
    %c0_i32 = arith.constant 0 : i32
    %c0_i32_0 = arith.constant 0 : i32
    %c0_i32_1 = arith.constant 0 : i32
    return %1, %c0_i32, %arg2, %c0_i32_0 : i32, i32, i32, i32
  }
  func.func @transform_2(%arg0: i32, %arg1: i32, %arg2: i32) -> (i32, i32, i32) {
    %c0_i32 = arith.constant 0 : i32
    %c0_i32_0 = arith.constant 0 : i32
    %c0_i32_1 = arith.constant 0 : i32
    return %arg0, %c0_i32, %c0_i32_0 : i32, i32, i32
  }
  func.func @transform_3(%arg0: i32, %arg1: i32, %arg2: i32) -> (i32, i32, i32) {
    %c0_i32 = arith.constant 0 : i32
    %c0_i32_0 = arith.constant 0 : i32
    %c0_i32_1 = arith.constant 0 : i32
    return %arg0, %c0_i32, %c0_i32_0 : i32, i32, i32
  }
}

</mosaic_0001>

<bundles_post_ra>
// kernel: logcosh_dice_loss.1
= control target key start
LH: loop header
LB: loop body
LE: loop exit
PB: predicated region body
PF: predicated region fallthrough
CT: control target
= control target key end

     0   :  { %s495_s12 = smov 0   ;;  %s497_s13 = smov 0   ;;  %s539_s0 = inlined_call_operand.vmem [shape: f32[2,4,2,128], index: 0, kind: input, shape index: {}]   ;;  %s540_s1 = inlined_call_operand.vmem [shape: f32[2,4,2,128], index: 1, kind: input, shape index: {}]   ;;  %s541_s2 = inlined_call_operand.vmem [shape: f32[2,1,1], index: 2, kind: output, shape index: {0}]   ;;  %s542_s3 = inlined_call_operand.vmem [shape: f32[2,1,1], index: 3, kind: output, shape index: {1}]  }
   0x1   :  { %s499_s14 = smov 0  }
   0x2 LB: > { %s33_s15 = sadd.s32 1, %s468_s13  ;;  %p412_p0 = scmp.ge.s32.totalorder %s472_s14, 1  ;;  %s472_s14 = sphi %s499_s14, %s14_s14   ;;  %s468_s13 = sphi %s497_s13, %s544_s13   ;;  %s464_s12 = sphi %s495_s12, %s543_s12  }
   0x3   : > { %p35_p1 = scmp.ge.s32.totalorder %s33_s15, 2  ;;  %p187_p2 = scmp.lt.s32.totalorder %s472_s14, 3 }
   0x5   : > { %s546_s15 = smov (%p35_p1, %s33_s15), 0  ;;  %p188_p3 = pnand %p412_p0, %p187_p2 }
   0x6   : > { %p226_p4 = scmp.lt.s32.totalorder (!%p188_p3), %s464_s12, 1 }
   0x7   : > { %191 = sbr.rel (%p188_p3) target bundleno = 238 (0xee), region = 28 }
   0xc   : > { %v474_v0 = vmov 0.0   ;;  %s548_s12 = smov (!%p226_p4, %s464_s12), 1  ;;  %vm274_vm0 = vcmask 1041408   ;;  %vm286_vm1 = vcmask 0  }
   0xd   : > { %257 = vst [vmem:[#allocation2] sm:$0x3] %v474_v0  ;;  %258 = vst [vmem:[#allocation3] sm:$0x3] %v474_v0  ;;  %s419_s16 = sshll.u32 %s548_s12, 3  ;;  %s247_s25 = scalar_lea.vmem %s541_s2, %s548_s12 }
   0xe   : > { %s233_s19 = scalar_lea.vmem %s539_s0, %s419_s16  ;;  %s243_s22 = scalar_lea.vmem %s540_s1, %s419_s16 }
   0xf   : > { %v259_v1 = vld [vmem:[%s233_s19] sm:$0x3]  ;;  %s250_s29 = scalar_lea.vmem %s542_s3, %s548_s12 }
  0x10   : > { %v260_v2 = vld [vmem:[%s243_s22] sm:$0x3] }
  0x11   : > { %v262_v3 = vmul.f32 %v260_v2, %v259_v1  ;;  %v267_v4 = vadd.f32 %v260_v2, %v259_v1 }
  0x14   : > { %v261_v5 = vld [vmem:[#allocation2] sm:$0x3]  ;;  %v266_v6 = vld [vmem:[#allocation3] sm:$0x3] }
  0x15   : > { %v264_v7 = vadd.f32 %v262_v3, %v261_v5  ;;  %v269_v8 = vadd.f32 %v267_v4, %v266_v6 }
  0x17   : > { %265 = vst [vmem:[#allocation2] sm:$0x3] %v264_v7  ;;  %270 = vst [vmem:[#allocation3] sm:$0x3] %v269_v8 }
  0x1e   : > { %v273_v9 = vld [vmem:[#allocation2] sm:$0x3]  ;;  %v288_v10 = vld [vmem:[#allocation3] sm:$0x3] }
  0x1f   : > { %v275_v11 = vsel %vm274_vm0, %v273_v9, 0.0  ;;  %v289_v12 = vsel %vm274_vm0, %v288_v10, 0.0 }
  0x20   : > { %276 = vadd.xlane.f32.xlu0 %v275_v11 }
  0x24   : > { %290 = vadd.xlane.f32.xlu0 %v289_v12 }
  0xa9   : > { %v277_v13 = vpop.xlane.xlu0 %276 }
  0xaa   : > { %v278_v14 = vrot.slane %v277_v13, 4 }
  0xac   : > { %v279_v15 = vadd.f32 %v278_v14, %v277_v13 }
  0xad   : > { %v291_v16 = vpop.xlane.xlu0 %290 }
  0xae   : > { %v280_v17 = vrot.slane %v279_v15, 2  ;;  %v292_v18 = vrot.slane %v291_v16, 4 }
  0xb0   : > { %v293_v19 = vadd.f32 %v292_v18, %v291_v16  ;;  %v281_v20 = vadd.f32 %v280_v17, %v279_v15 }
  0xb2   : > { %v294_v21 = vrot.slane %v293_v19, 2  ;;  %v282_v22 = vrot.slane %v281_v20, 1 }
  0xb4   : > { %v295_v23 = vadd.f32 %v294_v21, %v293_v19  ;;  %v283_v24 = vadd.f32 %v282_v22, %v281_v20 }
  0xb6   : > { %421 = vpush %v283_v24  ;;  %v296_v25 = vrot.slane %v295_v23, 1 }
  0xb8   : > { %v297_v26 = vadd.f32 %v296_v25, %v295_v23 }
  0xba   : > { %423 = vpush %v297_v26 }
  0xe7   : > { %s422_s26 = spop %421 }
  0xe8   : > { %v285_v27 = vstv %s422_s26 }
  0xe9   : > { %287 = vst.msk [vmem:[%s247_s25] sm:$0x1] %vm286_vm1, %v285_v27 }
  0xeb   : > { %s424_s30 = spop %423 }
  0xec   : > { %v299_v28 = vstv %s424_s30 }
  0xed   : > { %300 = vst.msk [vmem:[%s250_s29] sm:$0x1] %vm286_vm1, %v299_v28 }
  0xee PF: > { %s14_s14 = sadd.s32 1, %s472_s14   ;;  %s543_s12 = smov %s468_s13 }
  0xef   : > { %p11_p5 = scmp.ge.s32.totalorder %s14_s14, 4   ;;  %s544_s13 = smov %s546_s15 }
  0xf1   :  { %13 = sbr.rel (!%p11_p5) target bundleno = 2 (0x2), region = 81 }

</bundles_post_ra>
